<compile_context>
chip_gen: v6e
topology: v6e:2x2x1
jax: 0.10.0
libtpu: 0.0.40
codegen_flags: <defaults>
</compile_context>

<pallas_src>
import math

import jax
import jax.numpy as jnp
import numpy as np
from jax import lax
from jax.experimental import pallas as pl
from jax.experimental.pallas import tpu as pltpu  # noqa: F401  (TPU backend)

# ---- module hyperparams (ATTENTION_CONFIG equivalent) ----
EMBED_DIM = 32
FF_DIM = 64
NUM_HEADS = 4
KEY_DIM = 8
HEAD_SIZE = KEY_DIM           # config['head_size'] is None -> key_dim
DROPOUT_RATE = 0.1            # unused: forward is run with training=False
USE_RELATIVE_ATTENTION = True
LN_EPS = 1e-6

BATCH = 2
SEQ = 8
POS_DEPTH = 4                 # pos_encoding is 3-D: (S, S, POS_DEPTH)

HK = NUM_HEADS * KEY_DIM      # 32  (q / k width)
HV = NUM_HEADS * HEAD_SIZE    # 32  (v / context width)
C_QKVG = HK + HK + HV + EMBED_DIM      # 128: fused q|k|v|gate columns
C_FF = 2 * FF_DIM                      # 128: fused ff1|ff_gate columns
C_TOTAL = C_QKVG + C_FF + EMBED_DIM    # 288: + output projection columns


def _layer_norm(y, gamma, beta):
    mu = jnp.mean(y, axis=-1, keepdims=True)
    d = y - mu
    var = jnp.mean(d * d, axis=-1, keepdims=True)
    return d * lax.rsqrt(var + LN_EPS) * gamma + beta


def attention_block_kernel(x_ref, bias_ref, w_e_ref, w_f2_ref,
                           b_wide_ref, b_small_ref, out_ref):
    # Single invocation: N = B*S rows, everything resident in VMEM.
    x = x_ref[...]                       # (N, E) float32
    attn_bias = bias_ref[...]            # (N, N): rel-pos bias + cross-batch mask
    b_small = b_small_ref[...]           # (6, E): bo, bf2, g1, beta1, g2, beta2

    # ---- fused Q | K | V | gate projection: one lane-dense (E -> 128) matmul ----
    proj1 = (jnp.dot(x, w_e_ref[:, 0:C_QKVG],
                     preferred_element_type=jnp.float32)
             + b_wide_ref[0:1, :])       # (N, 128)

    inv_scale = 1.0 / math.sqrt(KEY_DIM)
    ctx_parts = []
    for h in range(NUM_HEADS):           # tiny static unroll (4 heads)
        qh = proj1[:, h * KEY_DIM:(h + 1) * KEY_DIM]                    # (N, K)
        kh = proj1[:, HK + h * KEY_DIM:HK + (h + 1) * KEY_DIM]          # (N, K)
        vh = proj1[:, 2 * HK + h * HEAD_SIZE:
                   2 * HK + (h + 1) * HEAD_SIZE]                        # (N, Dh)
        # One (N, N) score matmul per head covers every batch element at once;
        # attn_bias carries the relative-position term and a -1e30 additive
        # mask on cross-batch pairs, so the softmax stays batch-local.
        s = (jnp.dot(qh, kh.T, preferred_element_type=jnp.float32) * inv_scale
             + attn_bias)
        s = s - jnp.max(s, axis=-1, keepdims=True)
        p = jnp.exp(s)
        p = p * pl.reciprocal(jnp.sum(p, axis=-1, keepdims=True), approx=True)
        ctx_parts.append(jnp.dot(p, vh, preferred_element_type=jnp.float32))
    context = jnp.concatenate(ctx_parts, axis=-1)                       # (N, HV)

    attn_out = (jnp.dot(context, w_e_ref[:, C_QKVG + C_FF:C_TOTAL],
                        preferred_element_type=jnp.float32)
                + b_small[0:1, :])
    gate = jax.nn.sigmoid(proj1[:, C_QKVG - EMBED_DIM:C_QKVG])
    attn_out = gate * attn_out
    # TODO(synk): dropout skipped — forward semantics reproduced for training=False.

    x1 = _layer_norm(x + attn_out, b_small[2:3, :], b_small[3:4, :])

    # ---- fused gated feed-forward: one lane-dense matmul for ff1|ff_gate ----
    proj2 = (jnp.dot(x1, w_e_ref[:, C_QKVG:C_QKVG + C_FF],
                     preferred_element_type=jnp.float32)
             + b_wide_ref[1:2, :])       # (N, 128)
    ff = proj2[:, 0:FF_DIM] * jax.nn.sigmoid(proj2[:, FF_DIM:2 * FF_DIM])
    ff = (jnp.dot(ff, w_f2_ref[...], preferred_element_type=jnp.float32)
          + b_small[1:2, :])

    out_ref[...] = _layer_norm(x1 + ff, b_small[4:5, :], b_small[5:6, :])


def attention_block(x, pos, params):
    B, S, E = x.shape
    (wq, bq, wk, bk, wv, bv, wo, bo, wg, bg,
     wf1, bf1, wfg, bfg, wf2, bf2, g1, beta1, g2, beta2) = params

    # --- batch-invariant precompute hoisted out of the kernel ---
    if USE_RELATIVE_ATTENTION:
        pos_red = jnp.mean(pos[:S, :S, :], axis=-1)                # (S, S)
    else:
        pos_red = jnp.zeros((S, S), jnp.float32)
    row_b = jnp.arange(B * S) // S
    same_batch = row_b[:, None] == row_b[None, :]
    attn_bias = jnp.where(same_batch, jnp.tile(pos_red, (B, B)),
                          jnp.float32(-1e30)).astype(jnp.float32)  # (B*S, B*S)

    # --- pack 20 parameter arrays into 4 contiguous slabs (fewer DMAs) ---
    w_e = jnp.concatenate([wq, wk, wv, wg, wf1, wfg, wo], axis=1)  # (E, 288)
    b_wide = jnp.concatenate(
        [jnp.concatenate([bq, bk, bv, bg], axis=1),
         jnp.concatenate([bf1, bfg], axis=1)], axis=0)             # (2, 128)
    b_small = jnp.concatenate([bo, bf2, g1, beta1, g2, beta2], axis=0)  # (6, E)

    x2 = x.reshape(B * S, E)

    out = pl.pallas_call(
        attention_block_kernel,
        out_shape=jax.ShapeDtypeStruct((B * S, E), jnp.float32),
    )(x2, attn_bias, w_e, wf2, b_wide, b_small)
    return out.reshape(B, S, E)


def init_linear(key, in_dim, out_dim):
    """PyTorch nn.Linear-style uniform init; weight stored as (in, out)."""
    k1, k2 = jax.random.split(key)
    bound = 1.0 / math.sqrt(in_dim)
    w = jax.random.uniform(k1, (in_dim, out_dim), jnp.float32, -bound, bound)
    b = jax.random.uniform(k2, (1, out_dim), jnp.float32, -bound, bound)
    return w, b


def reference_forward(x, pos, params):
    """Pure-JAX mirror of the PyTorch forward (training=False) for checking."""
    (wq, bq, wk, bk, wv, bv, wo, bo, wg, bg,
     wf1, bf1, wfg, bfg, wf2, bf2, g1, beta1, g2, beta2) = params
    B, S, E = x.shape
    q = (x @ wq + bq).reshape(B, S, NUM_HEADS, KEY_DIM).transpose(0, 2, 1, 3)
    k = (x @ wk + bk).reshape(B, S, NUM_HEADS, KEY_DIM).transpose(0, 2, 3, 1)
    v = (x @ wv + bv).reshape(B, S, NUM_HEADS, HEAD_SIZE).transpose(0, 2, 1, 3)
    scores = jnp.matmul(q, k) / jnp.sqrt(jnp.float32(KEY_DIM))
    if USE_RELATIVE_ATTENTION:
        pos_red = jnp.mean(pos[:S, :S, :], axis=-1)[None, None, :, :]
        scores = scores + pos_red
    probs = jax.nn.softmax(scores, axis=-1)
    ctx = jnp.matmul(probs, v).transpose(0, 2, 1, 3).reshape(B, S, -1)
    attn_out = ctx @ wo + bo
    attn_out = jax.nn.sigmoid(x @ wg + bg) * attn_out
    x1 = _layer_norm(x + attn_out, g1, beta1)
    ff = (x1 @ wf1 + bf1) * jax.nn.sigmoid(x1 @ wfg + bfg)
    ff = ff @ wf2 + bf2
    return _layer_norm(x1 + ff, g2, beta2)


if __name__ == "__main__":
    root = jax.random.PRNGKey(0)
    keys = jax.random.split(root, 12)

    wq, bq = init_linear(keys[0], EMBED_DIM, NUM_HEADS * KEY_DIM)
    wk, bk = init_linear(keys[1], EMBED_DIM, NUM_HEADS * KEY_DIM)
    wv, bv = init_linear(keys[2], EMBED_DIM, NUM_HEADS * HEAD_SIZE)
    wo, bo = init_linear(keys[3], NUM_HEADS * HEAD_SIZE, EMBED_DIM)
    wg, bg = init_linear(keys[4], EMBED_DIM, EMBED_DIM)
    wf1, bf1 = init_linear(keys[5], EMBED_DIM, FF_DIM)
    wfg, bfg = init_linear(keys[6], EMBED_DIM, FF_DIM)
    wf2, bf2 = init_linear(keys[7], FF_DIM, EMBED_DIM)
    g1 = jnp.ones((1, EMBED_DIM), jnp.float32)
    beta1 = jnp.zeros((1, EMBED_DIM), jnp.float32)
    g2 = jnp.ones((1, EMBED_DIM), jnp.float32)
    beta2 = jnp.zeros((1, EMBED_DIM), jnp.float32)

    params = (wq, bq, wk, bk, wv, bv, wo, bo, wg, bg,
              wf1, bf1, wfg, bfg, wf2, bf2, g1, beta1, g2, beta2)

    x = jax.random.normal(keys[8], (BATCH, SEQ, EMBED_DIM), jnp.float32)
    pos = jax.random.normal(keys[9], (SEQ, SEQ, POS_DEPTH), jnp.float32) * 0.1

    out = attention_block(x, pos, params)
    out = jax.block_until_ready(out)

    ref = reference_forward(x, pos, params)
    np.testing.assert_allclose(np.asarray(out), np.asarray(ref), rtol=2e-2, atol=2e-2)

    print("KERNEL_OK")
</pallas_src>

<mosaic_0001>
module attributes {stable_mosaic.version = 11 : i64} {
  func.func @attention_block_kernel(%arg0: memref<16x32xf32, #tpu.memory_space<vmem>>, %arg1: memref<16x16xf32, #tpu.memory_space<vmem>>, %arg2: memref<32x288xf32, #tpu.memory_space<vmem>>, %arg3: memref<64x32xf32, #tpu.memory_space<vmem>>, %arg4: memref<2x128xf32, #tpu.memory_space<vmem>>, %arg5: memref<6x32xf32, #tpu.memory_space<vmem>>, %arg6: memref<16x32xf32, #tpu.memory_space<vmem>>) attributes {dimension_semantics = [], scalar_prefetch = 0 : i64, scratch_operands = 0 : i64, tpu.core_type = #tpu.core_type<tc>} {
    %c0 = arith.constant 0 : index
    %c0_0 = arith.constant 0 : index
    %0 = vector.load %arg0[%c0, %c0_0] : memref<16x32xf32, #tpu.memory_space<vmem>>, vector<16x32xf32>
    %c0_1 = arith.constant 0 : index
    %c0_2 = arith.constant 0 : index
    %1 = vector.load %arg1[%c0_1, %c0_2] : memref<16x16xf32, #tpu.memory_space<vmem>>, vector<16x16xf32>
    %c0_3 = arith.constant 0 : index
    %c0_4 = arith.constant 0 : index
    %2 = vector.load %arg5[%c0_3, %c0_4] : memref<6x32xf32, #tpu.memory_space<vmem>>, vector<6x32xf32>
    %c0_5 = arith.constant 0 : index
    %c0_6 = arith.constant 0 : index
    %3 = vector.load %arg2[%c0_5, %c0_6] : memref<32x288xf32, #tpu.memory_space<vmem>>, vector<32x128xf32>
    %cst = arith.constant dense<0.000000e+00> : vector<16x128xf32>
    %4 = tpu.matmul %0, %3, %cst {dimension_numbers = #tpu.dot_dimension_numbers<[1], [0], [0], [1], [0, 0, 1, 1], [], []>} : vector<16x32xf32>, vector<32x128xf32>, vector<16x128xf32> -> vector<16x128xf32>
    %c0_7 = arith.constant 0 : index
    %c0_8 = arith.constant 0 : index
    %5 = vector.load %arg4[%c0_7, %c0_8] : memref<2x128xf32, #tpu.memory_space<vmem>>, vector<1x128xf32>
    %6 = vector.broadcast %5 : vector<1x128xf32> to vector<16x128xf32>
    %7 = arith.addf %4, %6 : vector<16x128xf32>
    %8 = vector.extract_strided_slice %7 {offsets = [0, 0], sizes = [16, 8], strides = [1, 1]} : vector<16x128xf32> to vector<16x8xf32>
    %9 = vector.extract_strided_slice %7 {offsets = [0, 32], sizes = [16, 8], strides = [1, 1]} : vector<16x128xf32> to vector<16x8xf32>
    %10 = vector.extract_strided_slice %7 {offsets = [0, 64], sizes = [16, 8], strides = [1, 1]} : vector<16x128xf32> to vector<16x8xf32>
    %11 = tpu.transpose %9, [1, 0] : vector<16x8xf32> -> vector<8x16xf32>
    %cst_9 = arith.constant dense<0.000000e+00> : vector<16x16xf32>
    %12 = tpu.matmul %8, %11, %cst_9 {dimension_numbers = #tpu.dot_dimension_numbers<[1], [0], [0], [1], [0, 0, 1, 1], [], []>} : vector<16x8xf32>, vector<8x16xf32>, vector<16x16xf32> -> vector<16x16xf32>
    %cst_10 = arith.constant 0.353553385 : f32
    %13 = vector.broadcast %cst_10 : f32 to vector<16x16xf32>
    %14 = arith.mulf %12, %13 : vector<16x16xf32>
    %15 = arith.addf %14, %1 : vector<16x16xf32>
    %cst_11 = arith.constant dense<0xFF800000> : vector<16xf32>
    %16 = vector.multi_reduction <maximumf>, %15, %cst_11 [1] : vector<16x16xf32> to vector<16xf32>
    %17 = vector.shape_cast %16 : vector<16xf32> to vector<16x1xf32>
    %18 = vector.broadcast %17 : vector<16x1xf32> to vector<16x16xf32>
    %19 = arith.subf %15, %18 : vector<16x16xf32>
    %20 = math.exp %19 : vector<16x16xf32>
    %cst_12 = arith.constant dense<0.000000e+00> : vector<16xf32>
    %21 = vector.multi_reduction <add>, %20, %cst_12 [1] : vector<16x16xf32> to vector<16xf32>
    %22 = vector.shape_cast %21 : vector<16xf32> to vector<16x1xf32>
    %23 = tpu.reciprocal %22 {approx = true} : vector<16x1xf32> -> vector<16x1xf32>
    %24 = vector.broadcast %23 : vector<16x1xf32> to vector<16x16xf32>
    %25 = arith.mulf %20, %24 : vector<16x16xf32>
    %cst_13 = arith.constant dense<0.000000e+00> : vector<16x8xf32>
    %26 = tpu.matmul %25, %10, %cst_13 {dimension_numbers = #tpu.dot_dimension_numbers<[1], [0], [0], [1], [0, 0, 1, 1], [], []>} : vector<16x16xf32>, vector<16x8xf32>, vector<16x8xf32> -> vector<16x8xf32>
    %27 = vector.extract_strided_slice %7 {offsets = [0, 8], sizes = [16, 8], strides = [1, 1]} : vector<16x128xf32> to vector<16x8xf32>
    %28 = vector.extract_strided_slice %7 {offsets = [0, 40], sizes = [16, 8], strides = [1, 1]} : vector<16x128xf32> to vector<16x8xf32>
    %29 = vector.extract_strided_slice %7 {offsets = [0, 72], sizes = [16, 8], strides = [1, 1]} : vector<16x128xf32> to vector<16x8xf32>
    %30 = tpu.transpose %28, [1, 0] : vector<16x8xf32> -> vector<8x16xf32>
    %cst_14 = arith.constant dense<0.000000e+00> : vector<16x16xf32>
    %31 = tpu.matmul %27, %30, %cst_14 {dimension_numbers = #tpu.dot_dimension_numbers<[1], [0], [0], [1], [0, 0, 1, 1], [], []>} : vector<16x8xf32>, vector<8x16xf32>, vector<16x16xf32> -> vector<16x16xf32>
    %cst_15 = arith.constant 0.353553385 : f32
    %32 = vector.broadcast %cst_15 : f32 to vector<16x16xf32>
    %33 = arith.mulf %31, %32 : vector<16x16xf32>
    %34 = arith.addf %33, %1 : vector<16x16xf32>
    %cst_16 = arith.constant dense<0xFF800000> : vector<16xf32>
    %35 = vector.multi_reduction <maximumf>, %34, %cst_16 [1] : vector<16x16xf32> to vector<16xf32>
    %36 = vector.shape_cast %35 : vector<16xf32> to vector<16x1xf32>
    %37 = vector.broadcast %36 : vector<16x1xf32> to vector<16x16xf32>
    %38 = arith.subf %34, %37 : vector<16x16xf32>
    %39 = math.exp %38 : vector<16x16xf32>
    %cst_17 = arith.constant dense<0.000000e+00> : vector<16xf32>
    %40 = vector.multi_reduction <add>, %39, %cst_17 [1] : vector<16x16xf32> to vector<16xf32>
    %41 = vector.shape_cast %40 : vector<16xf32> to vector<16x1xf32>
    %42 = tpu.reciprocal %41 {approx = true} : vector<16x1xf32> -> vector<16x1xf32>
    %43 = vector.broadcast %42 : vector<16x1xf32> to vector<16x16xf32>
    %44 = arith.mulf %39, %43 : vector<16x16xf32>
    %cst_18 = arith.constant dense<0.000000e+00> : vector<16x8xf32>
    %45 = tpu.matmul %44, %29, %cst_18 {dimension_numbers = #tpu.dot_dimension_numbers<[1], [0], [0], [1], [0, 0, 1, 1], [], []>} : vector<16x16xf32>, vector<16x8xf32>, vector<16x8xf32> -> vector<16x8xf32>
    %46 = vector.extract_strided_slice %7 {offsets = [0, 16], sizes = [16, 8], strides = [1, 1]} : vector<16x128xf32> to vector<16x8xf32>
    %47 = vector.extract_strided_slice %7 {offsets = [0, 48], sizes = [16, 8], strides = [1, 1]} : vector<16x128xf32> to vector<16x8xf32>
    %48 = vector.extract_strided_slice %7 {offsets = [0, 80], sizes = [16, 8], strides = [1, 1]} : vector<16x128xf32> to vector<16x8xf32>
    %49 = tpu.transpose %47, [1, 0] : vector<16x8xf32> -> vector<8x16xf32>
    %cst_19 = arith.constant dense<0.000000e+00> : vector<16x16xf32>
    %50 = tpu.matmul %46, %49, %cst_19 {dimension_numbers = #tpu.dot_dimension_numbers<[1], [0], [0], [1], [0, 0, 1, 1], [], []>} : vector<16x8xf32>, vector<8x16xf32>, vector<16x16xf32> -> vector<16x16xf32>
    %cst_20 = arith.constant 0.353553385 : f32
    %51 = vector.broadcast %cst_20 : f32 to vector<16x16xf32>
    %52 = arith.mulf %50, %51 : vector<16x16xf32>
    %53 = arith.addf %52, %1 : vector<16x16xf32>
    %cst_21 = arith.constant dense<0xFF800000> : vector<16xf32>
    %54 = vector.multi_reduction <maximumf>, %53, %cst_21 [1] : vector<16x16xf32> to vector<16xf32>
    %55 = vector.shape_cast %54 : vector<16xf32> to vector<16x1xf32>
    %56 = vector.broadcast %55 : vector<16x1xf32> to vector<16x16xf32>
    %57 = arith.subf %53, %56 : vector<16x16xf32>
    %58 = math.exp %57 : vector<16x16xf32>
    %cst_22 = arith.constant dense<0.000000e+00> : vector<16xf32>
    %59 = vector.multi_reduction <add>, %58, %cst_22 [1] : vector<16x16xf32> to vector<16xf32>
    %60 = vector.shape_cast %59 : vector<16xf32> to vector<16x1xf32>
    %61 = tpu.reciprocal %60 {approx = true} : vector<16x1xf32> -> vector<16x1xf32>
    %62 = vector.broadcast %61 : vector<16x1xf32> to vector<16x16xf32>
    %63 = arith.mulf %58, %62 : vector<16x16xf32>
    %cst_23 = arith.constant dense<0.000000e+00> : vector<16x8xf32>
    %64 = tpu.matmul %63, %48, %cst_23 {dimension_numbers = #tpu.dot_dimension_numbers<[1], [0], [0], [1], [0, 0, 1, 1], [], []>} : vector<16x16xf32>, vector<16x8xf32>, vector<16x8xf32> -> vector<16x8xf32>
    %65 = vector.extract_strided_slice %7 {offsets = [0, 24], sizes = [16, 8], strides = [1, 1]} : vector<16x128xf32> to vector<16x8xf32>
    %66 = vector.extract_strided_slice %7 {offsets = [0, 56], sizes = [16, 8], strides = [1, 1]} : vector<16x128xf32> to vector<16x8xf32>
    %67 = vector.extract_strided_slice %7 {offsets = [0, 88], sizes = [16, 8], strides = [1, 1]} : vector<16x128xf32> to vector<16x8xf32>
    %68 = tpu.transpose %66, [1, 0] : vector<16x8xf32> -> vector<8x16xf32>
    %cst_24 = arith.constant dense<0.000000e+00> : vector<16x16xf32>
    %69 = tpu.matmul %65, %68, %cst_24 {dimension_numbers = #tpu.dot_dimension_numbers<[1], [0], [0], [1], [0, 0, 1, 1], [], []>} : vector<16x8xf32>, vector<8x16xf32>, vector<16x16xf32> -> vector<16x16xf32>
    %cst_25 = arith.constant 0.353553385 : f32
    %70 = vector.broadcast %cst_25 : f32 to vector<16x16xf32>
    %71 = arith.mulf %69, %70 : vector<16x16xf32>
    %72 = arith.addf %71, %1 : vector<16x16xf32>
    %cst_26 = arith.constant dense<0xFF800000> : vector<16xf32>
    %73 = vector.multi_reduction <maximumf>, %72, %cst_26 [1] : vector<16x16xf32> to vector<16xf32>
    %74 = vector.shape_cast %73 : vector<16xf32> to vector<16x1xf32>
    %75 = vector.broadcast %74 : vector<16x1xf32> to vector<16x16xf32>
    %76 = arith.subf %72, %75 : vector<16x16xf32>
    %77 = math.exp %76 : vector<16x16xf32>
    %cst_27 = arith.constant dense<0.000000e+00> : vector<16xf32>
    %78 = vector.multi_reduction <add>, %77, %cst_27 [1] : vector<16x16xf32> to vector<16xf32>
    %79 = vector.shape_cast %78 : vector<16xf32> to vector<16x1xf32>
    %80 = tpu.reciprocal %79 {approx = true} : vector<16x1xf32> -> vector<16x1xf32>
    %81 = vector.broadcast %80 : vector<16x1xf32> to vector<16x16xf32>
    %82 = arith.mulf %77, %81 : vector<16x16xf32>
    %cst_28 = arith.constant dense<0.000000e+00> : vector<16x8xf32>
    %83 = tpu.matmul %82, %67, %cst_28 {dimension_numbers = #tpu.dot_dimension_numbers<[1], [0], [0], [1], [0, 0, 1, 1], [], []>} : vector<16x16xf32>, vector<16x8xf32>, vector<16x8xf32> -> vector<16x8xf32>
    %84 = tpu.concatenate %26, %45, %64, %83 in 1 : vector<16x8xf32>, vector<16x8xf32>, vector<16x8xf32>, vector<16x8xf32> -> vector<16x32xf32>
    %c0_29 = arith.constant 0 : index
    %c256 = arith.constant 256 : index
    %85 = vector.load %arg2[%c0_29, %c256] : memref<32x288xf32, #tpu.memory_space<vmem>>, vector<32x32xf32>
    %cst_30 = arith.constant dense<0.000000e+00> : vector<16x32xf32>
    %86 = tpu.matmul %84, %85, %cst_30 {dimension_numbers = #tpu.dot_dimension_numbers<[1], [0], [0], [1], [0, 0, 1, 1], [], []>} : vector<16x32xf32>, vector<32x32xf32>, vector<16x32xf32> -> vector<16x32xf32>
    %87 = vector.extract_strided_slice %2 {offsets = [0, 0], sizes = [1, 32], strides = [1, 1]} : vector<6x32xf32> to vector<1x32xf32>
    %88 = vector.broadcast %87 : vector<1x32xf32> to vector<16x32xf32>
    %89 = arith.addf %86, %88 : vector<16x32xf32>
    %90 = vector.extract_strided_slice %7 {offsets = [0, 96], sizes = [16, 32], strides = [1, 1]} : vector<16x128xf32> to vector<16x32xf32>
    %91 = arith.negf %90 : vector<16x32xf32>
    %92 = math.exp %91 : vector<16x32xf32>
    %cst_31 = arith.constant 1.000000e+00 : f32
    %93 = vector.broadcast %cst_31 : f32 to vector<16x32xf32>
    %94 = arith.addf %93, %92 : vector<16x32xf32>
    %95 = arith.divf %93, %94 : vector<16x32xf32>
    %96 = arith.mulf %95, %89 : vector<16x32xf32>
    %97 = arith.addf %0, %96 : vector<16x32xf32>
    %98 = vector.extract_strided_slice %2 {offsets = [2, 0], sizes = [1, 32], strides = [1, 1]} : vector<6x32xf32> to vector<1x32xf32>
    %99 = vector.extract_strided_slice %2 {offsets = [3, 0], sizes = [1, 32], strides = [1, 1]} : vector<6x32xf32> to vector<1x32xf32>
    %cst_32 = arith.constant dense<0.000000e+00> : vector<16xf32>
    %100 = vector.multi_reduction <add>, %97, %cst_32 [1] : vector<16x32xf32> to vector<16xf32>
    %101 = vector.shape_cast %100 : vector<16xf32> to vector<16x1xf32>
    %cst_33 = arith.constant 3.200000e+01 : f32
    %102 = vector.broadcast %cst_33 : f32 to vector<16x1xf32>
    %103 = arith.divf %101, %102 : vector<16x1xf32>
    %104 = vector.broadcast %103 : vector<16x1xf32> to vector<16x32xf32>
    %105 = arith.subf %97, %104 : vector<16x32xf32>
    %106 = arith.mulf %105, %105 : vector<16x32xf32>
    %cst_34 = arith.constant dense<0.000000e+00> : vector<16xf32>
    %107 = vector.multi_reduction <add>, %106, %cst_34 [1] : vector<16x32xf32> to vector<16xf32>
    %108 = vector.shape_cast %107 : vector<16xf32> to vector<16x1xf32>
    %cst_35 = arith.constant 3.200000e+01 : f32
    %109 = vector.broadcast %cst_35 : f32 to vector<16x1xf32>
    %110 = arith.divf %108, %109 : vector<16x1xf32>
    %cst_36 = arith.constant 9.99999997E-7 : f32
    %111 = vector.broadcast %cst_36 : f32 to vector<16x1xf32>
    %112 = arith.addf %110, %111 : vector<16x1xf32>
    %113 = math.rsqrt %112 : vector<16x1xf32>
    %114 = vector.broadcast %113 : vector<16x1xf32> to vector<16x32xf32>
    %115 = arith.mulf %105, %114 : vector<16x32xf32>
    %116 = vector.broadcast %98 : vector<1x32xf32> to vector<16x32xf32>
    %117 = arith.mulf %115, %116 : vector<16x32xf32>
    %118 = vector.broadcast %99 : vector<1x32xf32> to vector<16x32xf32>
    %119 = arith.addf %117, %118 : vector<16x32xf32>
    %c0_37 = arith.constant 0 : index
    %c128 = arith.constant 128 : index
    %120 = vector.load %arg2[%c0_37, %c128] : memref<32x288xf32, #tpu.memory_space<vmem>>, vector<32x128xf32>
    %cst_38 = arith.constant dense<0.000000e+00> : vector<16x128xf32>
    %121 = tpu.matmul %119, %120, %cst_38 {dimension_numbers = #tpu.dot_dimension_numbers<[1], [0], [0], [1], [0, 0, 1, 1], [], []>} : vector<16x32xf32>, vector<32x128xf32>, vector<16x128xf32> -> vector<16x128xf32>
    %c1 = arith.constant 1 : index
    %c0_39 = arith.constant 0 : index
    %122 = vector.load %arg4[%c1, %c0_39] : memref<2x128xf32, #tpu.memory_space<vmem>>, vector<1x128xf32>
    %123 = vector.broadcast %122 : vector<1x128xf32> to vector<16x128xf32>
    %124 = arith.addf %121, %123 : vector<16x128xf32>
    %125 = vector.extract_strided_slice %124 {offsets = [0, 0], sizes = [16, 64], strides = [1, 1]} : vector<16x128xf32> to vector<16x64xf32>
    %126 = vector.extract_strided_slice %124 {offsets = [0, 64], sizes = [16, 64], strides = [1, 1]} : vector<16x128xf32> to vector<16x64xf32>
    %127 = arith.negf %126 : vector<16x64xf32>
    %128 = math.exp %127 : vector<16x64xf32>
    %cst_40 = arith.constant 1.000000e+00 : f32
    %129 = vector.broadcast %cst_40 : f32 to vector<16x64xf32>
    %130 = arith.addf %129, %128 : vector<16x64xf32>
    %131 = arith.divf %129, %130 : vector<16x64xf32>
    %132 = arith.mulf %125, %131 : vector<16x64xf32>
    %c0_41 = arith.constant 0 : index
    %c0_42 = arith.constant 0 : index
    %133 = vector.load %arg3[%c0_41, %c0_42] : memref<64x32xf32, #tpu.memory_space<vmem>>, vector<64x32xf32>
    %cst_43 = arith.constant dense<0.000000e+00> : vector<16x32xf32>
    %134 = tpu.matmul %132, %133, %cst_43 {dimension_numbers = #tpu.dot_dimension_numbers<[1], [0], [0], [1], [0, 0, 1, 1], [], []>} : vector<16x64xf32>, vector<64x32xf32>, vector<16x32xf32> -> vector<16x32xf32>
    %135 = vector.extract_strided_slice %2 {offsets = [1, 0], sizes = [1, 32], strides = [1, 1]} : vector<6x32xf32> to vector<1x32xf32>
    %136 = vector.broadcast %135 : vector<1x32xf32> to vector<16x32xf32>
    %137 = arith.addf %134, %136 : vector<16x32xf32>
    %138 = arith.addf %119, %137 : vector<16x32xf32>
    %139 = vector.extract_strided_slice %2 {offsets = [4, 0], sizes = [1, 32], strides = [1, 1]} : vector<6x32xf32> to vector<1x32xf32>
    %140 = vector.extract_strided_slice %2 {offsets = [5, 0], sizes = [1, 32], strides = [1, 1]} : vector<6x32xf32> to vector<1x32xf32>
    %cst_44 = arith.constant dense<0.000000e+00> : vector<16xf32>
    %141 = vector.multi_reduction <add>, %138, %cst_44 [1] : vector<16x32xf32> to vector<16xf32>
    %142 = vector.shape_cast %141 : vector<16xf32> to vector<16x1xf32>
    %cst_45 = arith.constant 3.200000e+01 : f32
    %143 = vector.broadcast %cst_45 : f32 to vector<16x1xf32>
    %144 = arith.divf %142, %143 : vector<16x1xf32>
    %145 = vector.broadcast %144 : vector<16x1xf32> to vector<16x32xf32>
    %146 = arith.subf %138, %145 : vector<16x32xf32>
    %147 = arith.mulf %146, %146 : vector<16x32xf32>
    %cst_46 = arith.constant dense<0.000000e+00> : vector<16xf32>
    %148 = vector.multi_reduction <add>, %147, %cst_46 [1] : vector<16x32xf32> to vector<16xf32>
    %149 = vector.shape_cast %148 : vector<16xf32> to vector<16x1xf32>
    %cst_47 = arith.constant 3.200000e+01 : f32
    %150 = vector.broadcast %cst_47 : f32 to vector<16x1xf32>
    %151 = arith.divf %149, %150 : vector<16x1xf32>
    %cst_48 = arith.constant 9.99999997E-7 : f32
    %152 = vector.broadcast %cst_48 : f32 to vector<16x1xf32>
    %153 = arith.addf %151, %152 : vector<16x1xf32>
    %154 = math.rsqrt %153 : vector<16x1xf32>
    %155 = vector.broadcast %154 : vector<16x1xf32> to vector<16x32xf32>
    %156 = arith.mulf %146, %155 : vector<16x32xf32>
    %157 = vector.broadcast %139 : vector<1x32xf32> to vector<16x32xf32>
    %158 = arith.mulf %156, %157 : vector<16x32xf32>
    %159 = vector.broadcast %140 : vector<1x32xf32> to vector<16x32xf32>
    %160 = arith.addf %158, %159 : vector<16x32xf32>
    %c0_49 = arith.constant 0 : index
    %c0_50 = arith.constant 0 : index
    %161 = vector.load %arg6[%c0_49, %c0_50] : memref<16x32xf32, #tpu.memory_space<vmem>>, vector<16x32xf32>
    tpu.vector_store %arg6[%c0_49, %c0_50], %160 {strides = array<i32>} : memref<16x32xf32, #tpu.memory_space<vmem>>, vector<16x32xf32>,
    return
  }
}

</mosaic_0001>

<bundles_post_ra>
// kernel: tpu_custom_call.1
= control target key start
LH: loop header
LB: loop body
LE: loop exit
PB: predicated region body
PF: predicated region fallthrough
CT: control target
= control target key end

     0   :  { %11 = vsyncpa [#allocation3], 0  ;;  %s2099_s0 = inlined_call_operand.hbm [shape: f32[16,32], index: 0, kind: input, shape index: {}]   ;;  %s2100_s1 = inlined_call_operand.hbm [shape: f32[16,16], index: 1, kind: input, shape index: {}]   ;;  %s2101_s2 = inlined_call_operand.vmem [shape: f32[32,288], index: 2, kind: input, shape index: {}]   ;;  %s2102_s3 = inlined_call_operand.vmem [shape: f32[64,32], index: 3, kind: input, shape index: {}]   ;;  %s2103_s4 = inlined_call_operand.hbm [shape: f32[2,128], index: 4, kind: input, shape index: {}]   ;;  %s2104_s5 = inlined_call_operand.vmem [shape: f32[6,32], index: 5, kind: input, shape index: {}]   ;;  %s2105_s6 = inlined_call_operand.hbm [shape: f32[16,32], index: 6, kind: output, shape index: {}]  }
   0x1   :  { %12 = vsyncpa [#allocation6], 0 }
   0x2   :  { %13 = vsyncpa [#allocation4], 0  ;;  %s1800_s21 = smov [#allocation5]   ;;  %s1801_s23 = smov [#allocation2]  }
   0x3   :  { %s31_s22 = sshll.u32 %s1800_s21, 4  ;;  %s19_s24 = sshll.u32 %s1801_s23, 4  ;;  %s32_s22 = int_to_ptr.vmem [resolvable:$true] %s31_s22  ;;  %s20_s24 = int_to_ptr.vmem [resolvable:$true] %s19_s24 }
   0x4   :  { %s1722_s25 = scalar_lea.vmem %s32_s22, 256  ;;  %p1727_p1 = scmp.lt.s32.totalorder %s32_s22, %s32_s22 }
   0x5   :  { %p1723_p0 = scmp.ne.s32.totalorder %s32_s22, %s1722_s25  ;;  %p1728_p2 = scmp.lt.s32.totalorder %s1722_s25, %s1722_s25 }
   0x7   :  { %p1729_p3 = por %p1728_p2, %p1727_p1 }
   0x9   :  { %p1730_p4 = pnand %p1729_p3, %p1723_p0 }
   0xb   :  { %1733 = shalt.err (!%p1730_p4)
}
   0xc   :  { %s1802_s26 = smov 128   ;;  %s1803_s27 = smov 8  }
   0xd   :  { %37 = dma.hbm_to_vmem [thread:$0]  %s2100_s1, 256, %s32_s22, [#allocation6], %s1802_s26, %s1802_s26, %s1803_s27  }
   0xe   :  { %s1742_s30 = scalar_lea.vmem %s20_s24, 256  ;;  %p1747_p6 = scmp.lt.s32.totalorder %s20_s24, %s20_s24 }
   0xf   :  { %p1743_p5 = scmp.ne.s32.totalorder %s20_s24, %s1742_s30  ;;  %p1748_p7 = scmp.lt.s32.totalorder %s1742_s30, %s1742_s30 }
  0x11   :  { %p1749_p8 = por %p1748_p7, %p1747_p6 }
  0x13   :  { %p1750_p9 = pnand %p1749_p8, %p1743_p5 }
  0x15   :  { %1753 = shalt.err (!%p1750_p9)
}
  0x16   :  { %25 = dma.hbm_to_vmem [thread:$0]  %s2099_s0, 256, %s20_s24, [#allocation3], %s1802_s26, %s1802_s26, %s1803_s27  }
  0x17   :  { %s1804_s9 = smov [#allocation7]  }
  0x18   :  { %s48_s10 = sshll.u32 %s1804_s9, 4  ;;  %s49_s10 = int_to_ptr.vmem [resolvable:$true] %s48_s10 }
  0x19   :  { %s1762_s11 = scalar_lea.vmem %s49_s10, 32  ;;  %p1767_p11 = scmp.lt.s32.totalorder %s49_s10, %s49_s10 }
  0x1a   :  { %p1763_p10 = scmp.ne.s32.totalorder %s49_s10, %s1762_s11  ;;  %p1768_p12 = scmp.lt.s32.totalorder %s1762_s11, %s1762_s11 }
  0x1c   :  { %p1769_p13 = por %p1768_p12, %p1767_p11 }
  0x1e   :  { %p1770_p0 = pnand %p1769_p13, %p1763_p10 }
  0x20   :  { %1773 = shalt.err (!%p1770_p0)
}
  0x21   :  { %51 = dma.hbm_to_vmem [thread:$0]  %s2103_s4, 32, %s49_s10, [#allocation6]  }
  0x22   :  { %1794 = dma.done.wait [#allocation3], 256  }
  0x23   :  { %1795 = vsyncadd [#allocation3], 4294967040 }
  0x24   :  { %1796 = dma.done.wait [#allocation6], 288  }
  0x25   :  { %1797 = vsyncadd [#allocation6], 4294967008  ;;  %vm77_vm0 = vcmask 261120   ;;  %v71_v0 = vld [vmem:[%s2101_s2 + $0x48] sm:$0xff]  ;;  %v70_v1 = vld [vmem:[%s2101_s2 + $0x30] sm:$0xff]  ;;  %vm165_vm1 = vcmask 64512  }
  0x26   :  { %1530 = vmatprep.subr.mxu1 %v71_v0  ;;  %v1876_v2 = vld [vmem:[#allocation2] sm:$0xff]  ;;  %v69_v3 = vld [vmem:[%s2101_s2 + $0x18] sm:$0xff]  ;;  %v1886_v5 = vld [vmem:[#allocation2 + $0x8] sm:$0xff]  ;;  %s1805_s19 = smov 88   ;;  %s1806_s20 = smov 96   ;;  %vm253_vm2 = vcmask 130048  }
  0x27   :  { %1531 = vmatpush3.msra.mxu1 %v71_v0  ;;  %1538 = vmatprep.mubr.msk.f32.mxu1 %vm77_vm0, %v1876_v2  ;;  %v68_v4 = vld [vmem:[%s2101_s2] sm:$0xff]  ;;  %s1807_s21 = smov 120   ;;  %v1916_v18 = vld [vmem:[#allocation5 + $0x8] sm:$0xff]  ;;  %v1918_v21 = vld [vmem:[#allocation5] sm:$0xff]  ;;  %s1808_s22 = smov 64   ;;  %vm1003_vm3 = vcmask 195584  }
  0x28   :  { %1532 = vmatprep.subr.mxu1 %v70_v1  ;;  %v1432_v6 = vld [vmem:[#allocation7] ss:$0 sm:$0xff]  ;;  %s1809_s23 = smov 56   ;;  %s1810_s24 = smov 80   ;;  %vm1290_vm4 = vcmask 523264  }
  0x29   :  { %1533 = vmatpush3.msra.mxu1 %v70_v1  ;;  %s1811_s25 = smov 112   ;;  %s1812_s28 = smov 48  }
  0x2a   :  { %1534 = vmatprep.subr.mxu1 %v69_v3  ;;  %s1813_s29 = smov 72   ;;  %s1814_s30 = smov 104  }
  0x2b   :  { %1535 = vmatpush3.msra.mxu1 %v69_v3  ;;  %s1815_s7 = smov 40   ;;  %s1816_s8 = smov 16  }
  0x2c   :  { %1536 = vmatprep.subr.mxu1 %v68_v4  ;;  %s1817_s15 = smov 24  }
  0x2d   :  { %1537 = vmatpush3.msra.mxu1 %v68_v4 }
  0x2e   :  { %1539 = vmatmul.mubr.msk.f32.vlgmr.msra.gmra.mxu1 %vm77_vm0, %v1886_v5 }
  0xee   :  { %v1540_v7 = vpop.f32.mrf.mxu1 }
  0xef   :  { %v1890_v8 = vadd.f32 %v1540_v7, %v1432_v6 }
  0xf0   :  { %v150_v9 = vpop.f32.mrf.mxu1 }
  0xf1   :  { %v1892_v10 = vadd.f32 %v1432_v6, %v150_v9  ;;  %369 = vrot.lane.b32.xlu1 %v1890_v8, %s1805_s19  ;;  %163 = vrot.lane.b32.xlu0 %v1890_v8, %s1806_s20 }
  0xf3   :  { %1545 = vmatprep.mubr.msk.f32.mxu1 %vm165_vm1, %v1892_v10 }
  0xf5   :  { %367 = vrot.lane.b32.xlu1 %v1892_v10, %s1805_s19  ;;  %161 = vrot.lane.b32.xlu0 %v1892_v10, %s1806_s20 }
  0xf9   :  { %365 = vrot.lane.b32.xlu1 %v1890_v8, %s1807_s21  ;;  %363 = vrot.lane.b32.xlu0 %v1892_v10, %s1807_s21 }
 0x163   :  { %v164_v11 = vpop.permute.xlu0 %163  ;;  %v370_v12 = vpop.permute.xlu1 %369 }
 0x164   :  { %1541 = vmatprep.subr.msk.mxu1 %vm165_vm1, %v164_v11 }
 0x165   :  { %1542 = vmatpush3.xpose.msk.msra.mxu1 %vm165_vm1, %v164_v11 }
 0x167   :  { %v162_v13 = vpop.permute.xlu0 %161  ;;  %v368_v15 = vpop.permute.xlu1 %367 }
 0x168   :  { %1543 = vmatprep.subr.msk.mxu1 %vm165_vm1, %v162_v13 }
 0x169   :  { %1544 = vmatpush3.xpose.msk.msra.mxu1 %vm165_vm1, %v162_v13 }
 0x16a   :  { %1555 = vmatprep.subr.msk.mxu1 %vm165_vm1, %v370_v12 }
 0x16b   :  { %v364_v14 = vpop.permute.xlu0 %363  ;;  %v366_v16 = vpop.permute.xlu1 %365 }
 0x16c   :  { %1546 = vmatmul.mubr.msk.f32.vlgmr.msra.gmra.mxu1 %vm165_vm1, %v1890_v8 }
 0x16d   :  { %1556 = vmatpush3.xpose.msk.msra.mxu1 %vm165_vm1, %v370_v12  ;;  %1559 = vmatprep.mubr.msk.f32.mxu1 %vm165_vm1, %v364_v14 }
 0x16e   :  { %1557 = vmatprep.subr.msk.mxu1 %vm165_vm1, %v368_v15 }
 0x171   :  { %1558 = vmatpush3.xpose.msk.msra.mxu1 %vm165_vm1, %v368_v15 }
 0x174   :  { %1560 = vmatmul.mubr.msk.f32.vlgmr.msra.gmra.mxu1 %vm165_vm1, %v366_v16 }
 0x22c   :  { %v1547_v17 = vpop.f32.mrf.mxu1 }
 0x22d   :  { %v250_v19 = vmul.f32 0.35355338, %v1547_v17 }
 0x22e   :  { %v240_v20 = vpop.f32.mrf.mxu1 }
 0x22f   :  { %v249_v22 = vmul.f32 0.35355338, %v240_v20  ;;  %v252_v23 = vadd.f32 %v250_v19, %v1916_v18 }
 0x231   :  { %v257_v24 = vsel %vm253_vm2, %v252_v23, -inf  ;;  %v251_v25 = vadd.f32 %v249_v22, %v1918_v21 }
 0x232   :  { %258 = vmax.xlane.f32.xlu1 %v257_v24 }
 0x233   :  { %v254_v26 = vsel %vm253_vm2, %v251_v25, -inf }
 0x234   :  { %v1561_v27 = vpop.f32.mrf.mxu1  ;;  %255 = vmax.xlane.f32.xlu0 %v254_v26 }
 0x235   :  { %v455_v29 = vmul.f32 0.35355338, %v1561_v27 }
 0x236   :  { %v445_v28 = vpop.f32.mrf.mxu1 }
 0x237   :  { %v454_v30 = vmul.f32 0.35355338, %v445_v28  ;;  %v457_v33 = vadd.f32 %v455_v29, %v1916_v18 }
 0x239   :  { %v456_v31 = vadd.f32 %v454_v30, %v1918_v21  ;;  %v461_v34 = vsel %vm253_vm2, %v457_v33, -inf }
 0x23b   :  { %v458_v32 = vsel %vm253_vm2, %v456_v31, -inf }
 0x23c   :  { %459 = vmax.xlane.f32.xlu0 %v458_v32 }
 0x240   :  { %462 = vmax.xlane.f32.xlu0 %v461_v34 }
 0x243   :  { %278 = vrot.lane.b32.xlu1 %v1890_v8, %s1808_s22 }
 0x247   :  { %482 = vrot.lane.b32.xlu1 %v1890_v8, %s1809_s23 }
 0x24b   :  { %480 = vrot.lane.b32.xlu1 %v1892_v10, %s1809_s23 }
 0x256   :  { %276 = vrot.lane.b32.xlu0 %v1892_v10, %s1808_s22 }
 0x2bb   :  { %v259_v35 = vpop.xlane.xlu1 %258 }
 0x2bc   :  { %v261_v36 = vsub.f32 %v252_v23, %v259_v35 }
 0x2bd   :  { %v256_v37 = vpop.xlane.xlu0 %255 }
 0x2be   :  { %v264_v38 = vmul.f32 1.442695, %v261_v36  ;;  %v260_v39 = vsub.f32 %v251_v25, %v256_v37 }
 0x2bf   :  { %v279_v40 = vpop.permute.xlu1 %278 }
 0x2c0   :  { %1658 = vpow2.f32 %v264_v38  ;;  %v262_v41 = vmul.f32 1.442695, %v260_v39  ;;  %1548 = vmatprep.subr.mxu0 %v279_v40 }
 0x2c1   :  { %1549 = vmatpush3.msra.mxu0 %v279_v40 }
 0x2c2   :  { %1660 = vpow2.f32 %v262_v41 }
 0x2c3   :  { %v483_v50 = vpop.permute.xlu1 %482 }
 0x2c5   :  { %v460_v42 = vpop.xlane.xlu0 %459 }
 0x2c6   :  { %v464_v54 = vsub.f32 %v456_v31, %v460_v42 }
 0x2c7   :  { %v481_v58 = vpop.permute.xlu1 %480 }
 0x2c8   :  { %v466_v55 = vmul.f32 1.442695, %v464_v54 }
 0x2c9   :  { %v463_v43 = vpop.xlane.xlu0 %462 }
 0x2ca   :  { %v465_v44 = vsub.f32 %v457_v33, %v463_v43 }
 0x2cc   :  { %v468_v45 = vmul.f32 1.442695, %v465_v44 }
 0x2cd   :  { %v1659_v46 = vpop.eup %1658  ;;  %v277_v47 = vpop.permute.xlu0 %276 }
 0x2ce   :  { %1662 = vpow2.f32 %v468_v45  ;;  %1550 = vmatprep.subr.mxu0 %v277_v47  ;;  %v269_v48 = vsel %vm253_vm2, %v1659_v46, 0.0 }
 0x2cf   :  { %v1661_v49 = vpop.eup %1660  ;;  %270 = vadd.xlane.f32.xlu0 %v269_v48  ;;  %1551 = vmatpush3.msra.mxu0 %v277_v47  ;;  %1664 = vpow2.f32 %v466_v55 }
 0x2d0   :  { %1562 = vmatprep.subr.mxu0 %v483_v50  ;;  %v266_v51 = vsel %vm253_vm2, %v1661_v49, 0.0 }
 0x2d1   :  { %267 = vadd.xlane.f32.xlu1 %v266_v51 }
 0x2db   :  { %v1663_v52 = vpop.eup %1662 }
 0x2dc   :  { %v473_v53 = vsel %vm253_vm2, %v1663_v52, 0.0  ;;  %v1665_v56 = vpop.eup %1664 }
 0x2dd   :  { %474 = vadd.xlane.f32.xlu0 %v473_v53  ;;  %v470_v57 = vsel %vm253_vm2, %v1665_v56, 0.0 }
 0x2e2   :  { %571 = vrot.lane.b32.xlu1 %v1892_v10, %s1810_s24 }
 0x2f3   :  { %573 = vrot.lane.b32.xlu0 %v1890_v8, %s1810_s24 }
 0x2f7   :  { %567 = vrot.lane.b32.xlu0 %v1892_v10, %s1811_s25 }
 0x306   :  { %471 = vadd.xlane.f32.xlu1 %v470_v57 }
 0x317   :  { %569 = vrot.lane.b32.xlu1 %v1890_v8, %s1811_s25 }
 0x358   :  { %v271_v59 = vpop.xlane.xlu0 %270 }
 0x359   :  { %1666 = vrcp.f32 %v271_v59 }
 0x35a   :  { %v268_v60 = vpop.xlane.xlu1 %267 }
 0x35b   :  { %1668 = vrcp.f32 %v268_v60 }
 0x35e   :  { %v572_v4 = vpop.permute.xlu1 %571 }
 0x366   :  { %v1667_v61 = vpop.eup %1666  ;;  %v475_v63 = vpop.xlane.xlu0 %474 }
 0x367   :  { %v275_v1 = vmul.f32 %v1667_v61, %v1659_v46  ;;  %1670 = vrcp.f32 %v475_v63 }
 0x368   :  { %v1669_v62 = vpop.eup %1668 }
 0x369   :  { %v274_v0 = vmul.f32 %v1669_v62, %v1661_v49 }
 0x36a   :  { %v574_v3 = vpop.permute.xlu0 %573 }
 0x36b   :  { %1552 = vmatprep.mubr.msk.f32.mxu0 %vm253_vm2, %v274_v0 }
 0x36c   :  { %1553 = vmatmul.mubr.msk.f32.vlgmr.msra.gmra.mxu0 %vm253_vm2, %v275_v1 }
 0x36d   :  { %1563 = vmatpush3.msra.mxu0 %v483_v50 }
 0x36e   :  { %1564 = vmatprep.subr.mxu0 %v481_v58  ;;  %v568_v13 = vpop.permute.xlu0 %567 }
 0x36f   :  { %1565 = vmatpush3.msra.mxu0 %v481_v58 }
 0x370   :  { %1569 = vmatprep.subr.msk.mxu0 %vm165_vm1, %v574_v3 }
 0x374   :  { %v1671_v7 = vpop.eup %1670 }
 0x375   :  { %v479_v12 = vmul.f32 %v1671_v7, %v1663_v52 }
 0x38f   :  { %v472_v6 = vpop.xlane.xlu1 %471 }
 0x390   :  { %1672 = vrcp.f32 %v472_v6 }
 0x393   :  { %v570_v14 = vpop.permute.xlu1 %569 }
 0x39d   :  { %v1673_v9 = vpop.eup %1672 }
 0x39e   :  { %v478_v11 = vmul.f32 %v1673_v9, %v1665_v56 }
 0x3a0   :  { %1566 = vmatprep.mubr.msk.f32.mxu0 %vm253_vm2, %v478_v11 }
 0x3a1   :  { %1567 = vmatmul.mubr.msk.f32.vlgmr.msra.gmra.mxu0 %vm253_vm2, %v479_v12 }
 0x3a2   :  { %1570 = vmatpush3.xpose.msk.msra.mxu0 %vm165_vm1, %v574_v3  ;;  %1573 = vmatprep.mubr.msk.f32.mxu0 %vm165_vm1, %v568_v13 }
 0x3a3   :  { %1571 = vmatprep.subr.msk.mxu0 %vm165_vm1, %v572_v4 }
 0x3a6   :  { %1572 = vmatpush3.xpose.msk.msra.mxu0 %vm165_vm1, %v572_v4 }
 0x3a9   :  { %1574 = vmatmul.mubr.msk.f32.vlgmr.msra.gmra.mxu0 %vm165_vm1, %v570_v14 }
 0x42c   :  { %v1952_v15 = vpop.f32.mrf.mxu0 }
 0x42e   :  { %v1954_v16 = vpop.f32.mrf.mxu0 }
 0x461   :  { %v1956_v17 = vpop.f32.mrf.mxu0 }
 0x463   :  { %v1958_v19 = vpop.f32.mrf.mxu0 }
 0x469   :  { %v1575_v20 = vpop.f32.mrf.mxu0 }
 0x46a   :  { %v659_v22 = vmul.f32 0.35355338, %v1575_v20  ;;  %v1009_v20 = vld [vmem:[%s2101_s2 + $0x58] sm:$0xff] }
 0x46b   :  { %v649_v23 = vpop.f32.mrf.mxu0 }
 0x46c   :  { %v658_v24 = vmul.f32 0.35355338, %v649_v23  ;;  %v661_v25 = vadd.f32 %v659_v22, %v1916_v18  ;;  %v1008_v22 = vld [vmem:[%s2101_s2 + $0x40] sm:$0xff]  ;;  %v1007_v23 = vld [vmem:[%s2101_s2 + $0x28] sm:$0xff] }
 0x46e   :  { %v665_v26 = vsel %vm253_vm2, %v661_v25, -inf  ;;  %v660_v27 = vadd.f32 %v658_v24, %v1918_v21  ;;  %v1006_v24 = vld [vmem:[%s2101_s2 + $0x10] sm:$0xff] }
 0x46f   :  { %666 = vmax.xlane.f32.xlu1 %v665_v26 }
 0x470   :  { %v662_v28 = vsel %vm253_vm2, %v660_v27, -inf }
 0x471   :  { %663 = vmax.xlane.f32.xlu0 %v662_v28 }
 0x480   :  { %686 = vrot.lane.b32.xlu1 %v1890_v8, %s1812_s28 }
 0x484   :  { %777 = vrot.lane.b32.xlu1 %v1890_v8, %s1813_s29 }
 0x488   :  { %775 = vrot.lane.b32.xlu1 %v1892_v10, %s1813_s29 }
 0x48c   :  { %773 = vrot.lane.b32.xlu1 %v1890_v8, %s1814_s30 }
 0x4f8   :  { %v667_v29 = vpop.xlane.xlu1 %666 }
 0x4f9   :  { %v669_v30 = vsub.f32 %v661_v25, %v667_v29 }
 0x4fa   :  { %v664_v31 = vpop.xlane.xlu0 %663 }
 0x4fb   :  { %v672_v32 = vmul.f32 1.442695, %v669_v30  ;;  %v668_v33 = vsub.f32 %v660_v27, %v664_v31 }
 0x4fc   :  { %v687_v34 = vpop.permute.xlu1 %686 }
 0x4fd   :  { %1674 = vpow2.f32 %v672_v32  ;;  %v670_v35 = vmul.f32 1.442695, %v668_v33  ;;  %1576 = vmatprep.subr.mxu1 %v687_v34 }
 0x4fe   :  { %1577 = vmatpush3.msra.mxu1 %v687_v34 }
 0x4ff   :  { %1676 = vpow2.f32 %v670_v35 }
 0x500   :  { %v778_v43 = vpop.permute.xlu1 %777 }
 0x504   :  { %v776_v49 = vpop.permute.xlu1 %775 }
 0x508   :  { %v774_v50 = vpop.permute.xlu1 %773 }
 0x50a   :  { %v1675_v36 = vpop.eup %1674 }
 0x50b   :  { %v677_v37 = vsel %vm253_vm2, %v1675_v36, 0.0 }
 0x50c   :  { %v1677_v38 = vpop.eup %1676  ;;  %678 = vadd.xlane.f32.xlu0 %v677_v37 }
 0x50d   :  { %v674_v39 = vsel %vm253_vm2, %v1677_v38, 0.0 }
 0x510   :  { %675 = vadd.xlane.f32.xlu0 %v674_v39  ;;  %v1010_v39 = vlaneseq }
 0x526   :  { %684 = vrot.lane.b32.xlu0 %v1892_v10, %s1812_s28 }
 0x52a   :  { %771 = vrot.lane.b32.xlu0 %v1892_v10, %s1814_s30 }
 0x595   :  { %v679_v40 = vpop.xlane.xlu0 %678 }
 0x596   :  { %1678 = vrcp.f32 %v679_v40  ;;  %v2014_v40 = vshrl.u32 %v1010_v39, 7  ;;  %v1280_v39 = vld [vmem:[%s2102_s3 + $0x10] sm:$0xff] }
 0x599   :  { %v676_v41 = vpop.xlane.xlu0 %675 }
 0x59a   :  { %1680 = vrcp.f32 %v676_v41 }
 0x59d   :  { %v685_v42 = vpop.permute.xlu0 %684 }
 0x59e   :  { %1578 = vmatprep.subr.mxu1 %v685_v42 }
 0x59f   :  { %1579 = vmatpush3.msra.mxu1 %v685_v42 }
 0x5a0   :  { %1583 = vmatprep.subr.msk.mxu1 %vm165_vm1, %v778_v43 }
 0x5a1   :  { %v772_v48 = vpop.permute.xlu0 %771 }
 0x5a3   :  { %v1679_v44 = vpop.eup %1678 }
 0x5a4   :  { %v683_v47 = vmul.f32 %v1679_v44, %v1675_v36 }
 0x5a7   :  { %v1681_v45 = vpop.eup %1680 }
 0x5a8   :  { %v682_v46 = vmul.f32 %v1681_v45, %v1677_v38 }
 0x5aa   :  { %1580 = vmatprep.mubr.msk.f32.mxu1 %vm253_vm2, %v682_v46  ;;  %v1462_v46 = vmul.f32 -1.442695, %v1890_v8 }
 0x5ab   :  { %1581 = vmatmul.mubr.msk.f32.vlgmr.msra.gmra.mxu1 %vm253_vm2, %v683_v47  ;;  %v1461_v47 = vmul.f32 -1.442695, %v1892_v10 }
 0x5ac   :  { %1584 = vmatpush3.xpose.msk.msra.mxu1 %vm165_vm1, %v778_v43  ;;  %1587 = vmatprep.mubr.msk.f32.mxu1 %vm165_vm1, %v772_v48 }
 0x5ad   :  { %1585 = vmatprep.subr.msk.mxu1 %vm165_vm1, %v776_v49 }
 0x5b0   :  { %1586 = vmatpush3.xpose.msk.msra.mxu1 %vm165_vm1, %v776_v49 }
 0x5b3   :  { %1588 = vmatmul.mubr.msk.f32.vlgmr.msra.gmra.mxu1 %vm165_vm1, %v774_v50 }
 0x66b   :  { %v1582_v51 = vpop.f32.mrf.mxu1 }
 0x66d   :  { %v762_v52 = vpop.f32.mrf.mxu1 }
 0x673   :  { %v1589_v53 = vpop.f32.mrf.mxu1 }
 0x674   :  { %v863_v54 = vmul.f32 0.35355338, %v1589_v53 }
 0x675   :  { %v853_v55 = vpop.f32.mrf.mxu1 }
 0x676   :  { %v862_v56 = vmul.f32 0.35355338, %v853_v55  ;;  %v865_v57 = vadd.f32 %v863_v54, %v1916_v18 }
 0x678   :  { %v869_v58 = vsel %vm253_vm2, %v865_v57, -inf  ;;  %v864_v59 = vadd.f32 %v862_v56, %v1918_v21 }
 0x679   :  { %870 = vmax.xlane.f32.xlu1 %v869_v58 }
 0x67a   :  { %v866_v60 = vsel %vm253_vm2, %v864_v59, -inf }
 0x67b   :  { %867 = vmax.xlane.f32.xlu0 %v866_v60 }
 0x68a   :  { %890 = vrot.lane.b32.xlu1 %v1890_v8, %s1815_s7 }
 0x68e   :  { %977 = vrot.lane.b32.xlu1 %v1958_v19, %s1803_s27 }
 0x692   :  { %979 = vrot.lane.b32.xlu1 %v1956_v17, %s1803_s27 }
 0x696   :  { %987 = vrot.lane.b32.xlu1 %v1582_v51, %s1816_s8 }
 0x702   :  { %v871_v18 = vpop.xlane.xlu1 %870 }
 0x703   :  { %v873_v61 = vsub.f32 %v865_v57, %v871_v18 }
 0x704   :  { %v868_v62 = vpop.xlane.xlu0 %867 }
 0x705   :  { %v876_v63 = vmul.f32 1.442695, %v873_v61  ;;  %v872_v21 = vsub.f32 %v864_v59, %v868_v62 }
 0x706   :  { %v891_v0 = vpop.permute.xlu1 %890 }
 0x707   :  { %1682 = vpow2.f32 %v876_v63  ;;  %v874_v1 = vmul.f32 1.442695, %v872_v21  ;;  %1590 = vmatprep.subr.mxu0 %v891_v0 }
 0x708   :  { %1591 = vmatpush3.msra.mxu0 %v891_v0 }
 0x709   :  { %1684 = vpow2.f32 %v874_v1 }
 0x70a   :  { %v978_v27 = vpop.permute.xlu1 %977 }
 0x70b   :  { %v999_v31 = vsel %vm165_vm1, %v1954_v16, %v978_v27  ;;  %v1012_v16 = vsub.s32 0, %v2014_v40 }
 0x70e   :  { %v980_v28 = vpop.permute.xlu1 %979 }
 0x70f   :  { %v1000_v33 = vsel %vm165_vm1, %v1952_v15, %v980_v28  ;;  %v2020_v15 = vld [vmem:[%s2104_s5] sm:$0x3f]  ;;  %s1818_s5 = smov 32  }
 0x710   :  { %v1013_v41 = vrot.slane %v2020_v15, %v1012_v16  ;;  %v1463_v16 = vld [vmem:[#allocation7 + $0x1] ss:$0 sm:$0xff] }
 0x712   :  { %v988_v29 = vpop.permute.xlu1 %987 }
 0x713   :  { %v1002_v36 = vsel %vm253_vm2, %v1000_v33, %v988_v29 }
 0x714   :  { %v1683_v3 = vpop.eup %1682 }
 0x715   :  { %v881_v4 = vsel %vm253_vm2, %v1683_v3, 0.0 }
 0x716   :  { %v1685_v6 = vpop.eup %1684  ;;  %882 = vadd.xlane.f32.xlu0 %v881_v4 }
 0x717   :  { %v878_v7 = vsel %vm253_vm2, %v1685_v6, 0.0 }
 0x71a   :  { %879 = vadd.xlane.f32.xlu0 %v878_v7  ;;  %v1168_v7 = vld [vmem:[%s2101_s2 + $0x38] sm:$0xff] }
 0x730   :  { %888 = vrot.lane.b32.xlu0 %v1892_v10, %s1815_s7 }
 0x734   :  { %985 = vrot.lane.b32.xlu0 %v762_v52, %s1816_s8 }
 0x79f   :  { %v883_v9 = vpop.xlane.xlu0 %882 }
 0x7a0   :  { %1686 = vrcp.f32 %v883_v9  ;;  %v1167_v9 = vld [vmem:[%s2101_s2 + $0x20] sm:$0xff] }
 0x7a3   :  { %v880_v11 = vpop.xlane.xlu0 %879 }
 0x7a4   :  { %1688 = vrcp.f32 %v880_v11  ;;  %v1166_v11 = vld [vmem:[%s2101_s2 + $0x8] sm:$0xff] }
 0x7a5   :  { %1690 = vpow2.f32 %v1462_v46 }
 0x7a6   :  { %1692 = vpow2.f32 %v1461_v47 }
 0x7a7   :  { %v889_v12 = vpop.permute.xlu0 %888 }
 0x7a8   :  { %1592 = vmatprep.subr.mxu0 %v889_v12 }
 0x7a9   :  { %1593 = vmatpush3.msra.mxu0 %v889_v12 }
 0x7aa   :  { %1597 = vmatprep.subr.mxu0 %v1009_v20 }
 0x7ab   :  { %v986_v30 = vpop.permute.xlu0 %985 }
 0x7ac   :  { %v1001_v34 = vsel %vm253_vm2, %v999_v31, %v986_v30 }
 0x7ad   :  { %v1687_v13 = vpop.eup %1686 }
 0x7ae   :  { %v887_v19 = vmul.f32 %v1687_v13, %v1683_v3 }
 0x7b1   :  { %v1689_v14 = vpop.eup %1688 }
 0x7b2   :  { %v886_v17 = vmul.f32 %v1689_v14, %v1685_v6  ;;  %v1691_v48 = vpop.eup %1690 }
 0x7b3   :  { %v1693_v49 = vpop.eup %1692  ;;  %v1102_v50 = vadd.f32 1.0, %v1691_v48 }
 0x7b4   :  { %1594 = vmatprep.mubr.msk.f32.mxu0 %vm253_vm2, %v886_v17  ;;  %v1101_v51 = vadd.f32 1.0, %v1693_v49 }
 0x7b5   :  { %1595 = vmatmul.mubr.msk.f32.vlgmr.msra.gmra.mxu0 %vm253_vm2, %v887_v19  ;;  %1694 = vrcp.f32 %v1102_v50 }
 0x7b6   :  { %1598 = vmatpush3.msra.mxu0 %v1009_v20  ;;  %1696 = vrcp.f32 %v1101_v51  ;;  %v1279_v51 = vld [vmem:[%s2102_s3 + $0x8] sm:$0xff] }
 0x7b7   :  { %1599 = vmatprep.subr.mxu0 %v1008_v22 }
 0x7b8   :  { %1600 = vmatpush3.msra.mxu0 %v1008_v22  ;;  %v1156_v22 = vsub.s32 2, %v2014_v40 }
 0x7b9   :  { %1601 = vmatprep.subr.mxu0 %v1007_v23 }
 0x7ba   :  { %1602 = vmatpush3.msra.mxu0 %v1007_v23  ;;  %v1162_v23 = vsub.s32 3, %v2014_v40 }
 0x7bb   :  { %1603 = vmatprep.subr.mxu0 %v1006_v24 }
 0x7bc   :  { %1604 = vmatpush3.msra.mxu0 %v1006_v24  ;;  %v1157_v24 = vrot.slane %v2020_v15, %v1156_v22  ;;  %v1163_v27 = vrot.slane %v2020_v15, %v1162_v23  ;;  %v1402_v23 = vsub.s32 4, %v2014_v40 }
 0x7c2   :  { %v1695_v52 = vpop.eup %1694 }
 0x7c3   :  { %v1697_v55 = vpop.eup %1696 }
 0x875   :  { %v1596_v25 = vpop.f32.mrf.mxu0 }
 0x876   :  { %995 = vrot.lane.b32.xlu1 %v1596_v25, %s1817_s15 }
 0x877   :  { %v966_v26 = vpop.f32.mrf.mxu0 }
 0x878   :  { %993 = vrot.lane.b32.xlu0 %v966_v26, %s1817_s15 }
 0x8e8   :  { %v996_v32 = vpop.permute.xlu1 %995 }
 0x8e9   :  { %v1005_v38 = vsel %vm1003_vm3, %v1002_v36, %v996_v32  ;;  %v1283_v36 = vld [vmem:[%s2102_s3 + $0x28] sm:$0xff] }
 0x8ea   :  { %v994_v35 = vpop.permute.xlu0 %993 }
 0x8eb   :  { %v1004_v37 = vsel %vm1003_vm3, %v1001_v34, %v994_v35  ;;  %v1285_v34 = vld [vmem:[%s2102_s3 + $0x38] sm:$0xff]  ;;  %v1284_v35 = vld [vmem:[%s2102_s3 + $0x30] sm:$0xff] }
 0x8ec   :  { %1605 = vmatprep.mubr.msk.f32.mxu0 %vm77_vm0, %v1004_v37  ;;  %1619 = vmatprep.subr.mxu0 %v1285_v34  ;;  %v1282_v37 = vld [vmem:[%s2102_s3 + $0x20] sm:$0xff] }
 0x8ed   :  { %1606 = vmatmul.mubr.msk.f32.vlgmr.msra.gmra.mxu0 %vm77_vm0, %v1005_v38  ;;  %v1281_v38 = vld [vmem:[%s2102_s3 + $0x18] sm:$0xff] }
 0x8ee   :  { %1620 = vmatpush3.msra.mxu0 %v1285_v34 }
 0x8ef   :  { %1621 = vmatprep.subr.mxu0 %v1284_v35 }
 0x8f0   :  { %1622 = vmatpush3.msra.mxu0 %v1284_v35 }
 0x8f1   :  { %1623 = vmatprep.subr.mxu0 %v1283_v36 }
 0x8f2   :  { %1624 = vmatpush3.msra.mxu0 %v1283_v36 }
 0x8f3   :  { %1625 = vmatprep.subr.mxu0 %v1282_v37 }
 0x8f4   :  { %1626 = vmatpush3.msra.mxu0 %v1282_v37 }
 0x8f5   :  { %1627 = vmatprep.subr.mxu0 %v1281_v38 }
 0x8f6   :  { %1628 = vmatpush3.msra.mxu0 %v1281_v38 }
 0x8f7   :  { %1629 = vmatprep.subr.mxu0 %v1280_v39 }
 0x8f8   :  { %1630 = vmatpush3.msra.mxu0 %v1280_v39 }
 0x8f9   :  { %1631 = vmatprep.subr.mxu0 %v1279_v51 }
 0x8fa   :  { %1632 = vmatpush3.msra.mxu0 %v1279_v51 }
 0x9ad   :  { %v1607_v42 = vpop.f32.mrf.mxu0 }
 0x9ae   :  { %v1092_v43 = vadd.f32 %v1607_v42, %v1013_v41 }
 0x9af   :  { %v1086_v44 = vpop.f32.mrf.mxu0 }
 0x9b0   :  { %v1087_v45 = vadd.f32 %v1086_v44, %v1013_v41  ;;  %1111 = vrot.lane.b32.xlu1 %v1092_v43, %s1806_s20 }
 0x9b2   :  { %1109 = vrot.lane.b32.xlu0 %v1087_v45, %s1806_s20 }
 0xa22   :  { %v1112_v53 = vpop.permute.xlu1 %1111 }
 0xa23   :  { %v1116_v54 = vmul.f32 %v1695_v52, %v1112_v53  ;;  %v1278_v52 = vld [vmem:[%s2102_s3] sm:$0xff]  ;;  %s1819_s3 = smov [#allocation8]  }
 0xa24   :  { %v1110_v56 = vpop.permute.xlu0 %1109  ;;  %1633 = vmatprep.subr.mxu0 %v1278_v52 }
 0xa25   :  { %v1115_v57 = vmul.f32 %v1697_v55, %v1110_v56  ;;  %1121 = vrot.lane.b32.xlu1 %v1116_v54, %s1818_s5  ;;  %1634 = vmatpush3.msra.mxu0 %v1278_v52 }
 0xa27   :  { %1119 = vrot.lane.b32.xlu0 %v1115_v57, %s1818_s5 }
 0xa97   :  { %v1122_v8 = vpop.permute.xlu1 %1121 }
 0xa98   :  { %v1126_v10 = vadd.f32 %v1122_v8, %v1886_v5 }
 0xa99   :  { %v1120_v58 = vpop.permute.xlu0 %1119 }
 0xa9a   :  { %v1125_v59 = vadd.f32 %v1120_v58, %v1876_v2  ;;  %v1130_v60 = vsel %vm77_vm0, %v1126_v10, 0.0  ;;  %v1169_v2 = vld [vmem:[%s2101_s2 + $0x50] sm:$0xff] }
 0xa9b   :  { %1131 = vadd.xlane.f32.xlu1 %v1130_v60  ;;  %1608 = vmatprep.subr.mxu1 %v1169_v2 }
 0xa9c   :  { %v1127_v18 = vsel %vm77_vm0, %v1125_v59, 0.0  ;;  %1609 = vmatpush3.msra.mxu1 %v1169_v2 }
 0xa9d   :  { %1128 = vadd.xlane.f32.xlu0 %v1127_v18  ;;  %1610 = vmatprep.subr.mxu1 %v1168_v7 }
 0xa9e   :  { %1611 = vmatpush3.msra.mxu1 %v1168_v7 }
 0xa9f   :  { %1612 = vmatprep.subr.mxu1 %v1167_v9 }
 0xaa0   :  { %1613 = vmatpush3.msra.mxu1 %v1167_v9 }
 0xaa1   :  { %1614 = vmatprep.subr.mxu1 %v1166_v11 }
 0xaa2   :  { %1615 = vmatpush3.msra.mxu1 %v1166_v11 }
 0xb24   :  { %v1132_v61 = vpop.xlane.xlu1 %1131 }
 0xb25   :  { %v1135_v62 = vmul.f32 0.03125, %v1132_v61 }
 0xb26   :  { %v1129_v63 = vpop.xlane.xlu0 %1128 }
 0xb27   :  { %v1134_v21 = vmul.f32 0.03125, %v1129_v63  ;;  %v1137_v0 = vsub.f32 %v1126_v10, %v1135_v62  ;;  %v1288_v10 = vsub.s32 1, %v2014_v40 }
 0xb29   :  { %v1136_v1 = vsub.f32 %v1125_v59, %v1134_v21  ;;  %v1139_v6 = vmul.f32 %v1137_v0, %v1137_v0  ;;  %v1289_v58 = vrot.slane %v2020_v15, %v1288_v10 }
 0xb2b   :  { %v1138_v3 = vmul.f32 %v1136_v1, %v1136_v1  ;;  %v1143_v5 = vsel %vm77_vm0, %v1139_v6, 0.0 }
 0xb2d   :  { %v1140_v4 = vsel %vm77_vm0, %v1138_v3, 0.0 }
 0xb2e   :  { %1141 = vadd.xlane.f32.xlu0 %v1140_v4 }
 0xb32   :  { %1144 = vadd.xlane.f32.xlu0 %v1143_v5 }
 0xbb7   :  { %v1142_v12 = vpop.xlane.xlu0 %1141 }
 0xbb8   :  { %v1146_v13 = vmul.f32 0.03125, %v1142_v12 }
 0xbba   :  { %v1148_v14 = vadd.f32 1e-06, %v1146_v13 }
 0xbbb   :  { %v1145_v17 = vpop.xlane.xlu0 %1144 }
 0xbbc   :  { %1698 = vrsqrt.f32 %v1148_v14  ;;  %v1147_v19 = vmul.f32 0.03125, %v1145_v17 }
 0xbbe   :  { %v1149_v20 = vadd.f32 1e-06, %v1147_v19 }
 0xbc0   :  { %1700 = vrsqrt.f32 %v1149_v20 }
 0xbc9   :  { %v1699_v25 = vpop.eup %1698 }
 0xbca   :  { %v1152_v26 = vmul.f32 %v1699_v25, %v1136_v1  ;;  %v1403_v25 = vrot.slane %v2020_v15, %v1402_v23 }
 0xbcc   :  { %v1158_v28 = vmul.f32 %v1157_v24, %v1152_v26 }
 0xbcd   :  { %v1701_v29 = vpop.eup %1700 }
 0xbce   :  { %v1153_v30 = vmul.f32 %v1701_v29, %v1137_v0  ;;  %v2049_v31 = vadd.f32 %v1163_v27, %v1158_v28 }
 0xbd0   :  { %v1159_v32 = vmul.f32 %v1157_v24, %v1153_v30  ;;  %1616 = vmatprep.mubr.msk.f32.mxu1 %vm77_vm0, %v2049_v31  ;;  %v1408_v24 = vsub.s32 5, %v2014_v40 }
 0xbd2   :  { %v1165_v33 = vadd.f32 %v1163_v27, %v1159_v32  ;;  %v1409_v28 = vrot.slane %v2020_v15, %v1408_v24 }
 0xbd4   :  { %1617 = vmatmul.mubr.msk.f32.vlgmr.msra.gmra.mxu1 %vm77_vm0, %v1165_v33 }
 0xc94   :  { %v1618_v41 = vpop.f32.mrf.mxu1 }
 0xc95   :  { %v1253_v42 = vadd.f32 %v1618_v41, %v1463_v16 }
 0xc96   :  { %v1247_v43 = vpop.f32.mrf.mxu1 }
 0xc97   :  { %v1467_v44 = vmul.f32 -1.442695, %v1253_v42  ;;  %v1248_v45 = vadd.f32 %v1463_v16, %v1247_v43 }
 0xc99   :  { %1702 = vpow2.f32 %v1467_v44  ;;  %v1466_v46 = vmul.f32 -1.442695, %v1248_v45 }
 0xc9b   :  { %1704 = vpow2.f32 %v1466_v46 }
 0xca6   :  { %v1703_v47 = vpop.eup %1702 }
 0xca7   :  { %v1263_v48 = vadd.f32 1.0, %v1703_v47 }
 0xca8   :  { %v1705_v49 = vpop.eup %1704 }
 0xca9   :  { %1706 = vrcp.f32 %v1263_v48  ;;  %v1262_v50 = vadd.f32 1.0, %v1705_v49 }
 0xcab   :  { %1708 = vrcp.f32 %v1262_v50 }
 0xcb6   :  { %v1707_v53 = vpop.eup %1706 }
 0xcb7   :  { %1272 = vrot.lane.b32.xlu0 %v1707_v53, %s1808_s22 }
 0xcb8   :  { %v1709_v54 = vpop.eup %1708 }
 0xcb9   :  { %1270 = vrot.lane.b32.xlu1 %v1709_v54, %s1808_s22  ;;  %s1419_s22 = sshll.u32 %s1819_s3, 4  ;;  %s1420_s22 = int_to_ptr.vmem [resolvable:$true] %s1419_s22 }
 0xcba   :  { %s1774_s17 = scalar_lea.vmem %s1420_s22, 256  ;;  %p1779_p2 = scmp.lt.s32.totalorder %s1420_s22, %s1420_s22 }
 0xcbb   :  { %p1775_p1 = scmp.ne.s32.totalorder %s1420_s22, %s1774_s17  ;;  %p1780_p3 = scmp.lt.s32.totalorder %s1774_s17, %s1774_s17 }
 0xcbd   :  { %p1781_p4 = por %p1780_p3, %p1779_p2 }
 0xcbf   :  { %p1782_p5 = pnand %p1781_p4, %p1775_p1 }
 0xd29   :  { %v1273_v55 = vpop.permute.xlu0 %1272 }
 0xd2a   :  { %v1277_v8 = vmul.f32 %v1273_v55, %v1253_v42 }
 0xd2b   :  { %v1271_v56 = vpop.permute.xlu1 %1270 }
 0xd2c   :  { %v1276_v57 = vmul.f32 %v1271_v56, %v1248_v45 }
 0xd2e   :  { %1635 = vmatprep.mubr.msk.f32.mxu0 %vm1290_vm4, %v1276_v57 }
 0xd2f   :  { %1636 = vmatmul.mubr.msk.f32.vlgmr.msra.gmra.mxu0 %vm1290_vm4, %v1277_v8 }
 0xdef   :  { %v1637_v59 = vpop.f32.mrf.mxu0 }
 0xdf0   :  { %v1369_v60 = vadd.f32 %v1637_v59, %v1289_v58 }
 0xdf1   :  { %v1363_v18 = vpop.f32.mrf.mxu0 }
 0xdf2   :  { %v1364_v61 = vadd.f32 %v1363_v18, %v1289_v58  ;;  %v1373_v62 = vadd.f32 %v1369_v60, %v1165_v33 }
 0xdf4   :  { %v1377_v63 = vsel %vm77_vm0, %v1373_v62, 0.0  ;;  %v1372_v21 = vadd.f32 %v1364_v61, %v2049_v31 }
 0xdf5   :  { %1378 = vadd.xlane.f32.xlu0 %v1377_v63 }
 0xdf6   :  { %v1374_v0 = vsel %vm77_vm0, %v1372_v21, 0.0 }
 0xdf7   :  { %1375 = vadd.xlane.f32.xlu1 %v1374_v0 }
 0xe7e   :  { %v1379_v1 = vpop.xlane.xlu0 %1378 }
 0xe7f   :  { %v1381_v3 = vmul.f32 0.03125, %v1379_v1 }
 0xe80   :  { %v1376_v4 = vpop.xlane.xlu1 %1375 }
 0xe81   :  { %v1383_v6 = vsub.f32 %v1373_v62, %v1381_v3  ;;  %v1380_v5 = vmul.f32 0.03125, %v1376_v4 }
 0xe83   :  { %v1382_v2 = vsub.f32 %v1372_v21, %v1380_v5  ;;  %v1385_v7 = vmul.f32 %v1383_v6, %v1383_v6 }
 0xe85   :  { %v1389_v9 = vsel %vm77_vm0, %v1385_v7, 0.0  ;;  %v1384_v11 = vmul.f32 %v1382_v2, %v1382_v2 }
 0xe86   :  { %1390 = vadd.xlane.f32.xlu0 %v1389_v9 }
 0xe87   :  { %v1386_v12 = vsel %vm77_vm0, %v1384_v11, 0.0 }
 0xe88   :  { %1387 = vadd.xlane.f32.xlu1 %v1386_v12 }
 0xf0f   :  { %v1391_v13 = vpop.xlane.xlu0 %1390 }
 0xf10   :  { %v1393_v14 = vmul.f32 0.03125, %v1391_v13 }
 0xf11   :  { %v1388_v17 = vpop.xlane.xlu1 %1387 }
 0xf12   :  { %v1395_v19 = vadd.f32 1e-06, %v1393_v14  ;;  %v1392_v20 = vmul.f32 0.03125, %v1388_v17 }
 0xf14   :  { %1710 = vrsqrt.f32 %v1395_v19  ;;  %v1394_v22 = vadd.f32 1e-06, %v1392_v20 }
 0xf16   :  { %1712 = vrsqrt.f32 %v1394_v22 }
 0xf21   :  { %v1711_v26 = vpop.eup %1710 }
 0xf22   :  { %v1399_v27 = vmul.f32 %v1711_v26, %v1383_v6 }
 0xf23   :  { %v1713_v29 = vpop.eup %1712 }
 0xf24   :  { %v1398_v30 = vmul.f32 %v1713_v29, %v1382_v2  ;;  %v1405_v31 = vmul.f32 %v1403_v25, %v1399_v27 }
 0xf26   :  { %v1404_v32 = vmul.f32 %v1403_v25, %v1398_v30  ;;  %v1411_v33 = vadd.f32 %v1409_v28, %v1405_v31 }
 0xf28   :  { %v1410_v34 = vadd.f32 %v1409_v28, %v1404_v32  ;;  %1413 = vst.msk [vmem:[#allocation8 + $0x8] sm:$0xff] %vm77_vm0, %v1411_v33 }
 0xf2a   :  { %1412 = vst.msk [vmem:[#allocation8] sm:$0xff] %vm77_vm0, %v1410_v34 }
 0xf2b   :  { %1785 = shalt.err (!%p1782_p5)
}
 0xf2c   :  { %1425 = dma.vmem_to_hbm [thread:$0]  %s1420_s22, 256, %s2105_s6, [#allocation4], %s1802_s26, %s1802_s26, %s1803_s27  }
 0xf2d   :  { %1798 = dma.done.wait [#allocation4], 256  }
 0xf2e   :  { %1799 = vsyncadd [#allocation4], 4294967040 }
 0xf2f   :  { %1429 = vsyncpa [#allocation3], 1 }
 0xf30   :  { %1430 = vsyncpa [#allocation6], 1 }
 0xf31   :  { %1431 = vsyncpa [#allocation4], 1 }

</bundles_post_ra>
